<compile_context>
chip_gen: v6e
topology: v6e:2x2x1
jax: 0.10.0
libtpu: 0.0.40
codegen_flags: <defaults>
</compile_context>

<pallas_src>
import jax
import jax.numpy as jnp
from jax.experimental import pallas as pl
from jax.experimental.pallas import tpu as pltpu


# ----------------------------------------------------------------------------
# Fused Pallas kernel: encoder GEMM + ReLU + decoder sub-pixel GEMMs + sigmoid
# ----------------------------------------------------------------------------
def _autoencoder_kernel(p_ref, we_ref, be_ref, s_ref, wd_ref, bd_ref, o_ref):
    f32 = jnp.float32
    # ---------------- encoder: Conv2d(4->8, k3, s2, p1) + ReLU --------------
    # (8, 40) @ (40, P) -> (8, P); positions on lanes, channels on sublanes.
    h = jnp.dot(we_ref[...], p_ref[...], preferred_element_type=f32)
    h = jnp.maximum(h + be_ref[...], 0.0)

    # ------ neighbour maps h[i, j+1], h[i+1, j], h[i+1, j+1] (masked) -------
    # Computed as (8,P) @ (P,P) with constant 0/1 shift+mask matrices: the MXU
    # has plenty of slack and this avoids unaligned lane slices / relayouts.
    hs01 = jnp.dot(h, s_ref[0], preferred_element_type=f32)
    hs10 = jnp.dot(h, s_ref[1], preferred_element_type=f32)
    hs11 = jnp.dot(h, s_ref[2], preferred_element_type=f32)

    # ------ decoder: ConvTranspose2d(8->4, k3, s2, p1, op1), sub-pixel ------
    # rows of acc = (py, px, cout): 4 output phases x 4 channels = 16.
    acc = jnp.dot(wd_ref[0], h, preferred_element_type=f32)
    acc = acc + jnp.dot(wd_ref[1], hs01, preferred_element_type=f32)
    acc = acc + jnp.dot(wd_ref[2], hs10, preferred_element_type=f32)
    acc = acc + jnp.dot(wd_ref[3], hs11, preferred_element_type=f32)
    acc = acc + bd_ref[...]

    # sigmoid with the divide routed through the EUP approximate reciprocal.
    o_ref[...] = pl.reciprocal(1.0 + jnp.exp(-acc), approx=True).astype(o_ref.dtype)


def _run_fused_kernel(patches_t, w_enc_t, b_enc, s_shift, w_dec, b_dec_t):
    kdim, p_cnt = patches_t.shape          # (40, P)
    n_hid = w_enc_t.shape[0]               # 8
    n_rows = w_dec.shape[1]                # 16 = 4 phases x 4 out channels
    flops = 2 * (n_hid * kdim * p_cnt
                 + 3 * n_hid * p_cnt * p_cnt
                 + 4 * n_rows * n_hid * p_cnt)
    bytes_accessed = 4 * (patches_t.size + w_enc_t.size + b_enc.size
                          + s_shift.size + w_dec.size + b_dec_t.size
                          + n_rows * p_cnt)
    return pl.pallas_call(
        _autoencoder_kernel,
        out_shape=jax.ShapeDtypeStruct((n_rows, p_cnt), jnp.float32),
        grid=(1,),
        in_specs=[
            pl.BlockSpec(patches_t.shape, lambda i: (0, 0)),
            pl.BlockSpec(w_enc_t.shape, lambda i: (0, 0)),
            pl.BlockSpec(b_enc.shape, lambda i: (0, 0)),
            pl.BlockSpec(s_shift.shape, lambda i: (0, 0, 0)),
            pl.BlockSpec(w_dec.shape, lambda i: (0, 0, 0)),
            pl.BlockSpec(b_dec_t.shape, lambda i: (0, 0)),
        ],
        out_specs=pl.BlockSpec((n_rows, p_cnt), lambda i: (0, 0)),
        compiler_params=pltpu.CompilerParams(
            dimension_semantics=("arbitrary",)),
        cost_estimate=pl.CostEstimate(
            flops=flops, transcendentals=n_rows * p_cnt,
            bytes_accessed=bytes_accessed),
    )(patches_t, w_enc_t, b_enc, s_shift, w_dec, b_dec_t)


# ----------------------------------------------------------------------------
# Deterministic parameter init (PyTorch-style uniform bounds)
# ----------------------------------------------------------------------------
def init_params(key):
    c_in, c_hid, k = 4, 8, 3
    k1, k2, k3, k4 = jax.random.split(key, 4)
    b_enc = 1.0 / jnp.sqrt(c_in * k * k)
    b_dec = 1.0 / jnp.sqrt(c_hid * k * k)
    return {
        # encoder Conv2d weight: (out, in, kh, kw)
        "enc_w": jax.random.uniform(k1, (c_hid, c_in, k, k), jnp.float32, -b_enc, b_enc),
        "enc_b": jax.random.uniform(k2, (c_hid,), jnp.float32, -b_enc, b_enc),
        # decoder ConvTranspose2d weight: (in, out, kh, kw)
        "dec_w": jax.random.uniform(k3, (c_hid, c_in, k, k), jnp.float32, -b_dec, b_dec),
        "dec_b": jax.random.uniform(k4, (c_in,), jnp.float32, -b_dec, b_dec),
    }


# ----------------------------------------------------------------------------
# One-time weight preprocessing (hoisted out of the forward path)
# ----------------------------------------------------------------------------
def prepare_params(params, batch):
    f32 = jnp.float32
    enc_w, enc_b = params["enc_w"], params["enc_b"]      # (8,4,3,3), (8,)
    dec_w, dec_b = params["dec_w"], params["dec_b"]      # (8,4,3,3), (4,)

    # Encoder GEMM weight, transposed: rows = cout, cols = (tap=ki*3+kj, cin),
    # K padded 36 -> 40 (multiple of 8) with zeros.
    w_enc_t = jnp.transpose(enc_w, (0, 2, 3, 1)).reshape(8, 36)
    w_enc_t = jnp.concatenate([w_enc_t, jnp.zeros((8, 4), f32)], axis=1)
    b_enc = enc_b.reshape(8, 1)

    # Decoder sub-pixel phase weights.  Equivalent direct-conv kernel is the
    # spatially flipped, channel-swapped ConvTranspose weight:
    #   Wflip(ky,kx)[ci, co] = dec_w[ci, co, 2-ky, 2-kx]
    # Output phases (py, px) of out[2i+py, 2j+px]:
    #   P00: h[i,j]@W(1,1)
    #   P01: h[i,j]@W(1,0) + h[i,j+1]@W(1,2)
    #   P10: h[i,j]@W(0,1) + h[i+1,j]@W(2,1)
    #   P11: h[i,j]@W(0,0) + h[i,j+1]@W(0,2) + h[i+1,j]@W(2,0) + h[i+1,j+1]@W(2,2)
    def wf(ky, kx):                      # (ci, co) -> transpose to (co, ci)
        return dec_w[:, :, 2 - ky, 2 - kx].T
    z = jnp.zeros((4, 8), f32)
    w_a = jnp.concatenate([wf(1, 1), wf(1, 0), wf(0, 1), wf(0, 0)], axis=0)  # h[i,j]
    w_b = jnp.concatenate([z,        wf(1, 2), z,        wf(0, 2)], axis=0)  # h[i,j+1]
    w_c = jnp.concatenate([z,        z,        wf(2, 1), wf(2, 0)], axis=0)  # h[i+1,j]
    w_d = jnp.concatenate([z,        z,        z,        wf(2, 2)], axis=0)  # h[i+1,j+1]
    w_dec = jnp.stack([w_a, w_b, w_c, w_d])              # (4, 16, 8)
    b_dec_t = jnp.tile(dec_b, 4).reshape(16, 1)          # rows = (phase, cout)

    # Constant shift+mask matrices for the neighbour gathers on the (8, P)
    # hidden map (P = batch*64, column p = n*64 + i*8 + j):
    #   (h @ S_k)[:, p] = h[:, p+k] if valid else 0
    p_cnt = batch * 64
    pos = jnp.arange(p_cnt)
    jj, ii = pos % 8, (pos // 8) % 8

    def smat(k, mask):
        return ((jnp.arange(p_cnt)[:, None] == (pos[None, :] + k))
                & mask[None, :]).astype(f32)

    s_shift = jnp.stack([
        smat(1, jj != 7),                     # h[i, j+1]
        smat(8, ii != 7),                     # h[i+1, j]
        smat(9, (ii != 7) & (jj != 7)),       # h[i+1, j+1]
    ])                                        # (3, P, P)

    return dict(w_enc_t=w_enc_t, b_enc=b_enc, w_dec=w_dec,
                b_dec_t=b_dec_t, s_shift=s_shift)


# ----------------------------------------------------------------------------
# ConvAutoencoder.forward  (NCHW in / NCHW out, like PyTorch)
# ----------------------------------------------------------------------------
@jax.jit
def conv_autoencoder_forward(prep, x_nchw):
    n, c, hgt, wdt = x_nchw.shape
    assert (c, hgt, wdt) == (4, 16, 16)
    assert prep["s_shift"].shape[-1] == n * 64

    # Stride-2 im2col, built transposed: rows = (tap, cin), cols = (n, oh, ow).
    xp = jnp.pad(x_nchw, ((0, 0), (0, 0), (1, 1), (1, 1)))          # (n,4,18,18)
    taps = [xp[:, :, ki:ki + 16:2, kj:kj + 16:2]                    # (n,4,8,8)
            for ki in range(3) for kj in range(3)]
    pt = jnp.stack(taps, axis=0)                                    # (9,n,4,8,8)
    pt = jnp.transpose(pt, (0, 2, 1, 3, 4)).reshape(36, n * 64)
    pt = jnp.concatenate([pt, jnp.zeros((4, n * 64), pt.dtype)], axis=0)  # K->40

    y2d = _run_fused_kernel(pt, prep["w_enc_t"], prep["b_enc"],
                            prep["s_shift"], prep["w_dec"], prep["b_dec_t"])

    # (16, n*64): rows = (py, px, cout), cols = (n, i, j)  ->  NCHW
    y = y2d.reshape(2, 2, 4, n, 8, 8)                 # (py, px, co, n, i, j)
    y = jnp.transpose(y, (3, 2, 4, 0, 5, 1))          # (n, co, i, py, j, px)
    return y.reshape(n, 4, 16, 16)


# ----------------------------------------------------------------------------
# Pure-JAX reference (lax conv) used for a correctness sanity check
# ----------------------------------------------------------------------------
def _reference_forward(params, x_nchw):
    dn = jax.lax.conv_dimension_numbers(x_nchw.shape, params["enc_w"].shape,
                                        ("NCHW", "OIHW", "NCHW"))
    h = jax.lax.conv_general_dilated(x_nchw, params["enc_w"], (2, 2),
                                     ((1, 1), (1, 1)), dimension_numbers=dn)
    h = jax.nn.relu(h + params["enc_b"][None, :, None, None])
    w_conv = jnp.flip(jnp.transpose(params["dec_w"], (1, 0, 2, 3)), axis=(2, 3))
    dn2 = jax.lax.conv_dimension_numbers(h.shape, w_conv.shape,
                                         ("NCHW", "OIHW", "NCHW"))
    y = jax.lax.conv_general_dilated(h, w_conv, (1, 1),
                                     ((1, 2), (1, 2)),   # k-1-p , k-1-p+out_pad
                                     lhs_dilation=(2, 2),
                                     dimension_numbers=dn2)
    y = jax.nn.sigmoid(y + params["dec_b"][None, :, None, None])
    return y


if __name__ == "__main__":
    key = jax.random.PRNGKey(0)
    pkey, xkey = jax.random.split(key)
    params = init_params(pkey)
    x = jax.random.normal(xkey, (2, 4, 16, 16), jnp.float32)   # NCHW, like PyTorch

    prep = prepare_params(params, batch=2)                     # one-time prep
    out = jax.block_until_ready(conv_autoencoder_forward(prep, x))
    assert out.shape == (2, 4, 16, 16), out.shape

    ref = jax.block_until_ready(_reference_forward(params, x))
    # tolerance loosened from 1e-5 only to cover the approximate EUP reciprocal
    err = float(jnp.max(jnp.abs(out - ref)))
    assert err < 2e-3, err

    print("KERNEL_OK")
</pallas_src>

<mosaic_0001>
module attributes {stable_mosaic.version = 11 : i64} {
  func.func @_autoencoder_kernel(%arg0: i32, %arg1: memref<40x128xf32, #tpu.memory_space<vmem>>, %arg2: memref<8x40xf32, #tpu.memory_space<vmem>>, %arg3: memref<8x1xf32, #tpu.memory_space<vmem>>, %arg4: memref<3x128x128xf32, #tpu.memory_space<vmem>>, %arg5: memref<4x16x8xf32, #tpu.memory_space<vmem>>, %arg6: memref<16x1xf32, #tpu.memory_space<vmem>>, %arg7: memref<16x128xf32, #tpu.memory_space<vmem>>) attributes {dimension_semantics = [#tpu.dimension_semantics<arbitrary>], iteration_bounds = array<i64: 1>, scalar_prefetch = 0 : i64, scratch_operands = 0 : i64, tpu.core_type = #tpu.core_type<tc>, window_params = [{pipeline_mode = #tpu.pipeline_mode<synchronous>, transform_indices = @transform_0, window_bounds = array<i64: 40, 128>}, {pipeline_mode = #tpu.pipeline_mode<synchronous>, transform_indices = @transform_1, window_bounds = array<i64: 8, 40>}, {pipeline_mode = #tpu.pipeline_mode<synchronous>, transform_indices = @transform_2, window_bounds = array<i64: 8, 1>}, {pipeline_mode = #tpu.pipeline_mode<synchronous>, transform_indices = @transform_3, window_bounds = array<i64: 3, 128, 128>}, {pipeline_mode = #tpu.pipeline_mode<synchronous>, transform_indices = @transform_4, window_bounds = array<i64: 4, 16, 8>}, {pipeline_mode = #tpu.pipeline_mode<synchronous>, transform_indices = @transform_5, window_bounds = array<i64: 16, 1>}, {pipeline_mode = #tpu.pipeline_mode<synchronous>, transform_indices = @transform_6, window_bounds = array<i64: 16, 128>}]} {
    %c0 = arith.constant 0 : index
    %c0_0 = arith.constant 0 : index
    %0 = vector.load %arg2[%c0, %c0_0] : memref<8x40xf32, #tpu.memory_space<vmem>>, vector<8x40xf32>
    %c0_1 = arith.constant 0 : index
    %c0_2 = arith.constant 0 : index
    %1 = vector.load %arg1[%c0_1, %c0_2] : memref<40x128xf32, #tpu.memory_space<vmem>>, vector<40x128xf32>
    %cst = arith.constant dense<0.000000e+00> : vector<8x128xf32>
    %2 = tpu.matmul %0, %1, %cst {dimension_numbers = #tpu.dot_dimension_numbers<[1], [0], [0], [1], [0, 0, 1, 1], [], []>} : vector<8x40xf32>, vector<40x128xf32>, vector<8x128xf32> -> vector<8x128xf32>
    %c0_3 = arith.constant 0 : index
    %c0_4 = arith.constant 0 : index
    %3 = vector.load %arg3[%c0_3, %c0_4] : memref<8x1xf32, #tpu.memory_space<vmem>>, vector<8x1xf32>
    %4 = vector.broadcast %3 : vector<8x1xf32> to vector<8x128xf32>
    %5 = arith.addf %2, %4 : vector<8x128xf32>
    %cst_5 = arith.constant 0.000000e+00 : f32
    %6 = vector.broadcast %cst_5 : f32 to vector<8x128xf32>
    %7 = arith.maximumf %5, %6 : vector<8x128xf32>
    %c0_6 = arith.constant 0 : index
    %c0_7 = arith.constant 0 : index
    %c0_8 = arith.constant 0 : index
    %8 = vector.load %arg4[%c0_6, %c0_7, %c0_8] : memref<3x128x128xf32, #tpu.memory_space<vmem>>, vector<1x128x128xf32>
    %9 = vector.shape_cast %8 : vector<1x128x128xf32> to vector<128x128xf32>
    %cst_9 = arith.constant dense<0.000000e+00> : vector<8x128xf32>
    %10 = tpu.matmul %7, %9, %cst_9 {dimension_numbers = #tpu.dot_dimension_numbers<[1], [0], [0], [1], [0, 0, 1, 1], [], []>} : vector<8x128xf32>, vector<128x128xf32>, vector<8x128xf32> -> vector<8x128xf32>
    %c1 = arith.constant 1 : index
    %c0_10 = arith.constant 0 : index
    %c0_11 = arith.constant 0 : index
    %11 = vector.load %arg4[%c1, %c0_10, %c0_11] : memref<3x128x128xf32, #tpu.memory_space<vmem>>, vector<1x128x128xf32>
    %12 = vector.shape_cast %11 : vector<1x128x128xf32> to vector<128x128xf32>
    %cst_12 = arith.constant dense<0.000000e+00> : vector<8x128xf32>
    %13 = tpu.matmul %7, %12, %cst_12 {dimension_numbers = #tpu.dot_dimension_numbers<[1], [0], [0], [1], [0, 0, 1, 1], [], []>} : vector<8x128xf32>, vector<128x128xf32>, vector<8x128xf32> -> vector<8x128xf32>
    %c2 = arith.constant 2 : index
    %c0_13 = arith.constant 0 : index
    %c0_14 = arith.constant 0 : index
    %14 = vector.load %arg4[%c2, %c0_13, %c0_14] : memref<3x128x128xf32, #tpu.memory_space<vmem>>, vector<1x128x128xf32>
    %15 = vector.shape_cast %14 : vector<1x128x128xf32> to vector<128x128xf32>
    %cst_15 = arith.constant dense<0.000000e+00> : vector<8x128xf32>
    %16 = tpu.matmul %7, %15, %cst_15 {dimension_numbers = #tpu.dot_dimension_numbers<[1], [0], [0], [1], [0, 0, 1, 1], [], []>} : vector<8x128xf32>, vector<128x128xf32>, vector<8x128xf32> -> vector<8x128xf32>
    %c0_16 = arith.constant 0 : index
    %c0_17 = arith.constant 0 : index
    %c0_18 = arith.constant 0 : index
    %17 = vector.load %arg5[%c0_16, %c0_17, %c0_18] : memref<4x16x8xf32, #tpu.memory_space<vmem>>, vector<1x16x8xf32>
    %18 = vector.shape_cast %17 : vector<1x16x8xf32> to vector<16x8xf32>
    %cst_19 = arith.constant dense<0.000000e+00> : vector<16x128xf32>
    %19 = tpu.matmul %18, %7, %cst_19 {dimension_numbers = #tpu.dot_dimension_numbers<[1], [0], [0], [1], [0, 0, 1, 1], [], []>} : vector<16x8xf32>, vector<8x128xf32>, vector<16x128xf32> -> vector<16x128xf32>
    %c1_20 = arith.constant 1 : index
    %c0_21 = arith.constant 0 : index
    %c0_22 = arith.constant 0 : index
    %20 = vector.load %arg5[%c1_20, %c0_21, %c0_22] : memref<4x16x8xf32, #tpu.memory_space<vmem>>, vector<1x16x8xf32>
    %21 = vector.shape_cast %20 : vector<1x16x8xf32> to vector<16x8xf32>
    %cst_23 = arith.constant dense<0.000000e+00> : vector<16x128xf32>
    %22 = tpu.matmul %21, %10, %cst_23 {dimension_numbers = #tpu.dot_dimension_numbers<[1], [0], [0], [1], [0, 0, 1, 1], [], []>} : vector<16x8xf32>, vector<8x128xf32>, vector<16x128xf32> -> vector<16x128xf32>
    %23 = arith.addf %19, %22 : vector<16x128xf32>
    %c2_24 = arith.constant 2 : index
    %c0_25 = arith.constant 0 : index
    %c0_26 = arith.constant 0 : index
    %24 = vector.load %arg5[%c2_24, %c0_25, %c0_26] : memref<4x16x8xf32, #tpu.memory_space<vmem>>, vector<1x16x8xf32>
    %25 = vector.shape_cast %24 : vector<1x16x8xf32> to vector<16x8xf32>
    %cst_27 = arith.constant dense<0.000000e+00> : vector<16x128xf32>
    %26 = tpu.matmul %25, %13, %cst_27 {dimension_numbers = #tpu.dot_dimension_numbers<[1], [0], [0], [1], [0, 0, 1, 1], [], []>} : vector<16x8xf32>, vector<8x128xf32>, vector<16x128xf32> -> vector<16x128xf32>
    %27 = arith.addf %23, %26 : vector<16x128xf32>
    %c3 = arith.constant 3 : index
    %c0_28 = arith.constant 0 : index
    %c0_29 = arith.constant 0 : index
    %28 = vector.load %arg5[%c3, %c0_28, %c0_29] : memref<4x16x8xf32, #tpu.memory_space<vmem>>, vector<1x16x8xf32>
    %29 = vector.shape_cast %28 : vector<1x16x8xf32> to vector<16x8xf32>
    %cst_30 = arith.constant dense<0.000000e+00> : vector<16x128xf32>
    %30 = tpu.matmul %29, %16, %cst_30 {dimension_numbers = #tpu.dot_dimension_numbers<[1], [0], [0], [1], [0, 0, 1, 1], [], []>} : vector<16x8xf32>, vector<8x128xf32>, vector<16x128xf32> -> vector<16x128xf32>
    %31 = arith.addf %27, %30 : vector<16x128xf32>
    %c0_31 = arith.constant 0 : index
    %c0_32 = arith.constant 0 : index
    %32 = vector.load %arg6[%c0_31, %c0_32] : memref<16x1xf32, #tpu.memory_space<vmem>>, vector<16x1xf32>
    %33 = vector.broadcast %32 : vector<16x1xf32> to vector<16x128xf32>
    %34 = arith.addf %31, %33 : vector<16x128xf32>
    %cst_33 = arith.constant 0.000000e+00 : f32
    %35 = vector.broadcast %cst_33 : f32 to vector<16x128xf32>
    %36 = arith.subf %35, %34 : vector<16x128xf32>
    %37 = math.exp %36 : vector<16x128xf32>
    %cst_34 = arith.constant 1.000000e+00 : f32
    %38 = vector.broadcast %cst_34 : f32 to vector<16x128xf32>
    %39 = arith.addf %38, %37 : vector<16x128xf32>
    %40 = tpu.reciprocal %39 {approx = true} : vector<16x128xf32> -> vector<16x128xf32>
    %c0_35 = arith.constant 0 : index
    %c0_36 = arith.constant 0 : index
    %41 = vector.load %arg7[%c0_35, %c0_36] : memref<16x128xf32, #tpu.memory_space<vmem>>, vector<16x128xf32>
    tpu.vector_store %arg7[%c0_35, %c0_36], %40 {strides = array<i32>} : memref<16x128xf32, #tpu.memory_space<vmem>>, vector<16x128xf32>,
    return
  }
  func.func @transform_0(%arg0: i32) -> (i32, i32) {
    %c0_i32 = arith.constant 0 : i32
    %c0_i32_0 = arith.constant 0 : i32
    %c0_i32_1 = arith.constant 0 : i32
    return %c0_i32, %c0_i32_0 : i32, i32
  }
  func.func @transform_1(%arg0: i32) -> (i32, i32) {
    %c0_i32 = arith.constant 0 : i32
    %c0_i32_0 = arith.constant 0 : i32
    %c0_i32_1 = arith.constant 0 : i32
    return %c0_i32, %c0_i32_0 : i32, i32
  }
  func.func @transform_2(%arg0: i32) -> (i32, i32) {
    %c0_i32 = arith.constant 0 : i32
    %c0_i32_0 = arith.constant 0 : i32
    %c0_i32_1 = arith.constant 0 : i32
    return %c0_i32, %c0_i32_0 : i32, i32
  }
  func.func @transform_3(%arg0: i32) -> (i32, i32, i32) {
    %c0_i32 = arith.constant 0 : i32
    %c0_i32_0 = arith.constant 0 : i32
    %c0_i32_1 = arith.constant 0 : i32
    %c0_i32_2 = arith.constant 0 : i32
    return %c0_i32, %c0_i32_0, %c0_i32_1 : i32, i32, i32
  }
  func.func @transform_4(%arg0: i32) -> (i32, i32, i32) {
    %c0_i32 = arith.constant 0 : i32
    %c0_i32_0 = arith.constant 0 : i32
    %c0_i32_1 = arith.constant 0 : i32
    %c0_i32_2 = arith.constant 0 : i32
    return %c0_i32, %c0_i32_0, %c0_i32_1 : i32, i32, i32
  }
  func.func @transform_5(%arg0: i32) -> (i32, i32) {
    %c0_i32 = arith.constant 0 : i32
    %c0_i32_0 = arith.constant 0 : i32
    %c0_i32_1 = arith.constant 0 : i32
    return %c0_i32, %c0_i32_0 : i32, i32
  }
  func.func @transform_6(%arg0: i32) -> (i32, i32) {
    %c0_i32 = arith.constant 0 : i32
    %c0_i32_0 = arith.constant 0 : i32
    %c0_i32_1 = arith.constant 0 : i32
    return %c0_i32, %c0_i32_0 : i32, i32
  }
}

</mosaic_0001>

<bundles_post_ra>
// kernel: conv_autoencoder_forward.1
= control target key start
LH: loop header
LB: loop body
LE: loop exit
PB: predicated region body
PF: predicated region fallthrough
CT: control target
= control target key end

     0   :  { %v1007_v0 = vmov 0.0   ;;  %vm1008_vm0 = vmmov 0   ;;  %v1009_v3 = vmov 0   ;;  %vm35_vm1 = vcmask 326656   ;;  %s1324_s0 = inlined_call_operand.vmem [shape: f32[40,128], index: 0, kind: input, shape index: {}]   ;;  %s1325_s2 = inlined_call_operand.vmem [shape: f32[8,1], index: 2, kind: input, shape index: {}]   ;;  %s1326_s3 = inlined_call_operand.vmem [shape: f32[3,128,128], index: 3, kind: input, shape index: {}]   ;;  %s1327_s5 = inlined_call_operand.vmem [shape: f32[16,1], index: 5, kind: input, shape index: {}]   ;;  %s1328_s1 = inlined_call_operand.vmem [shape: f32[8,40], index: 1, kind: input, shape index: {}]   ;;  %s1329_s4 = inlined_call_operand.vmem [shape: f32[4,16,8], index: 4, kind: input, shape index: {}]   ;;  %s1330_s6 = inlined_call_operand.vmem [shape: f32[16,128], index: 6, kind: output, shape index: {}]  }
   0x1   :  { %856 = vmatprep.subr.mxu0 %v1007_v0  ;;  %v28_v1 = vld [vmem:[%s1324_s0 + $0x20] sm:$0xff]  ;;  %v27_v2 = vld [vmem:[%s1324_s0 + $0x18] sm:$0xff]  ;;  %866 = vmatprep.mubr.msk.f32.mxu0 %vm1008_vm0, %v1007_v0  ;;  %v26_v4 = vld [vmem:[%s1324_s0 + $0x10] sm:$0xff]  ;;  %vm375_vm2 = vcmask 64512  }
   0x2   :  { %857 = vmatpush3.msra.mxu0 %v28_v1  ;;  %997 = vset.pattern.permute.xlu0 %v1009_v3  ;;  %v29_v5 = vld [vmem:[%s1325_s2] sm:$0xff]  ;;  %v125_v6 = vld [vmem:[%s1326_s3 + $0x78] sm:$0xff]  ;;  %v124_v7 = vld [vmem:[%s1326_s3 + $0x70] sm:$0xff] }
   0x3   :  { %858 = vmatprep.subr.mxu0 %v1007_v0  ;;  %869 = vmatprep.subr.mxu1 %v1007_v0  ;;  %v25_v8 = vld [vmem:[%s1324_s0 + $0x8] sm:$0xff]  ;;  %v710_v9 = vld [vmem:[%s1327_s5] sm:$0xff]  ;;  %v756_v13 = vld [vmem:[%s1326_s3 + $0xf8] sm:$0xff] }
   0x4   :  { %859 = vmatpush3.msra.mxu0 %v27_v2  ;;  %32 = vperm.xlu0 %997, %v29_v5   ;;  %v24_v10 = vld [vmem:[%s1324_s0] sm:$0xff]  ;;  %v123_v11 = vld [vmem:[%s1326_s3 + $0x68] sm:$0xff]  ;;  %v755_v15 = vld [vmem:[%s1326_s3 + $0xf0] sm:$0xff] }
   0x5   :  { %860 = vmatprep.subr.mxu0 %v1007_v0  ;;  %870 = vmatpush3.msra.mxu1 %v125_v6  ;;  %v23_v12 = vld [vmem:[%s1328_s1] sm:$0xff]  ;;  %v121_v16 = vld [vmem:[%s1326_s3 + $0x58] sm:$0xff]  ;;  %v754_v17 = vld [vmem:[%s1326_s3 + $0xe8] sm:$0xff] }
   0x6   :  { %861 = vmatpush3.msra.mxu0 %v26_v4  ;;  %871 = vmatprep.subr.mxu1 %v1007_v0  ;;  %v122_v14 = vld [vmem:[%s1326_s3 + $0x60] sm:$0xff]  ;;  %v120_v18 = vld [vmem:[%s1326_s3 + $0x50] sm:$0xff]  ;;  %v119_v20 = vld [vmem:[%s1326_s3 + $0x48] sm:$0xff] }
   0x7   :  { %862 = vmatprep.subr.mxu0 %v1007_v0  ;;  %872 = vmatpush3.msra.mxu1 %v124_v7  ;;  %v753_v19 = vld [vmem:[%s1326_s3 + $0xe0] sm:$0xff]  ;;  %v752_v21 = vld [vmem:[%s1326_s3 + $0xd8] sm:$0xff]  ;;  %v751_v23 = vld [vmem:[%s1326_s3 + $0xd0] sm:$0xff] }
   0x8   :  { %863 = vmatpush3.msra.mxu0 %v25_v8  ;;  %714 = vperm.xlu0 %997, %v710_v9   ;;  %v118_v22 = vld [vmem:[%s1326_s3 + $0x40] sm:$0xff]  ;;  %v117_v24 = vld [vmem:[%s1326_s3 + $0x38] sm:$0xff]  ;;  %v750_v25 = vld [vmem:[%s1326_s3 + $0xc8] sm:$0xff] }
   0x9   :  { %864 = vmatprep.subr.mxu0 %v1007_v0  ;;  %873 = vmatprep.subr.mxu1 %v1007_v0  ;;  %v116_v26 = vld [vmem:[%s1326_s3 + $0x30] sm:$0xff]  ;;  %v749_v27 = vld [vmem:[%s1326_s3 + $0xc0] sm:$0xff]  ;;  %v115_v28 = vld [vmem:[%s1326_s3 + $0x28] sm:$0xff] }
   0xa   :  { %865 = vmatpush3.msra.mxu0 %v24_v10  ;;  %874 = vmatpush3.msra.mxu1 %v123_v11  ;;  %v748_v29 = vld [vmem:[%s1326_s3 + $0xb8] sm:$0xff]  ;;  %v114_v30 = vld [vmem:[%s1326_s3 + $0x20] sm:$0xff]  ;;  %v747_v31 = vld [vmem:[%s1326_s3 + $0xb0] sm:$0xff] }
   0xb   :  { %867 = vmatmul.mubr.msk.f32.vlgmr.msra.gmra.mxu0 %vm35_vm1, %v23_v12  ;;  %904 = vmatprep.subr.mxu0 %v1007_v0  ;;  %v113_v32 = vld [vmem:[%s1326_s3 + $0x18] sm:$0xff]  ;;  %v746_v33 = vld [vmem:[%s1326_s3 + $0xa8] sm:$0xff]  ;;  %v112_v34 = vld [vmem:[%s1326_s3 + $0x10] sm:$0xff] }
   0xc   :  { %905 = vmatpush3.msra.mxu0 %v756_v13  ;;  %875 = vmatprep.subr.mxu1 %v1007_v0  ;;  %v745_v35 = vld [vmem:[%s1326_s3 + $0xa0] sm:$0xff]  ;;  %v744_v36 = vld [vmem:[%s1326_s3 + $0x98] sm:$0xff]  ;;  %v743_v37 = vld [vmem:[%s1326_s3 + $0x90] sm:$0xff] }
   0xd   :  { %906 = vmatprep.subr.mxu0 %v1007_v0  ;;  %876 = vmatpush3.msra.mxu1 %v122_v14  ;;  %v111_v38 = vld [vmem:[%s1326_s3 + $0x8] sm:$0xff]  ;;  %v110_v40 = vld [vmem:[%s1326_s3] sm:$0xff]  ;;  %v772_v47 = vld [vmem:[%s1326_s3 + $0x178] sm:$0xff] }
   0xe   :  { %907 = vmatpush3.msra.mxu0 %v755_v15  ;;  %877 = vmatprep.subr.mxu1 %v1007_v0  ;;  %v742_v39 = vld [vmem:[%s1326_s3 + $0x88] sm:$0xff]  ;;  %v741_v41 = vld [vmem:[%s1326_s3 + $0x80] sm:$0xff]  ;;  %v771_v48 = vld [vmem:[%s1326_s3 + $0x170] sm:$0xff] }
   0xf   :  { %908 = vmatprep.subr.mxu0 %v1007_v0  ;;  %878 = vmatpush3.msra.mxu1 %v121_v16  ;;  %v770_v49 = vld [vmem:[%s1326_s3 + $0x168] sm:$0xff]  ;;  %v769_v50 = vld [vmem:[%s1326_s3 + $0x160] sm:$0xff]  ;;  %v768_v51 = vld [vmem:[%s1326_s3 + $0x158] sm:$0xff] }
  0x10   :  { %909 = vmatpush3.msra.mxu0 %v754_v17  ;;  %879 = vmatprep.subr.mxu1 %v1007_v0  ;;  %v767_v52 = vld [vmem:[%s1326_s3 + $0x150] sm:$0xff]  ;;  %v766_v53 = vld [vmem:[%s1326_s3 + $0x148] sm:$0xff]  ;;  %v765_v54 = vld [vmem:[%s1326_s3 + $0x140] sm:$0xff] }
  0x11   :  { %910 = vmatprep.subr.mxu0 %v1007_v0  ;;  %880 = vmatpush3.msra.mxu1 %v120_v18  ;;  %v764_v55 = vld [vmem:[%s1326_s3 + $0x138] sm:$0xff]  ;;  %v763_v56 = vld [vmem:[%s1326_s3 + $0x130] sm:$0xff]  ;;  %v762_v57 = vld [vmem:[%s1326_s3 + $0x128] sm:$0xff] }
  0x12   :  { %911 = vmatpush3.msra.mxu0 %v753_v19  ;;  %881 = vmatprep.subr.mxu1 %v1007_v0  ;;  %v761_v58 = vld [vmem:[%s1326_s3 + $0x120] sm:$0xff]  ;;  %v760_v59 = vld [vmem:[%s1326_s3 + $0x118] sm:$0xff]  ;;  %v759_v60 = vld [vmem:[%s1326_s3 + $0x110] sm:$0xff] }
  0x13   :  { %912 = vmatprep.subr.mxu0 %v1007_v0  ;;  %882 = vmatpush3.msra.mxu1 %v119_v20  ;;  %v758_v61 = vld [vmem:[%s1326_s3 + $0x108] sm:$0xff]  ;;  %v757_v62 = vld [vmem:[%s1326_s3 + $0x100] sm:$0xff]  ;;  %v773_v63 = vld [vmem:[%s1329_s4 + $0x10] sm:$0xff] }
  0x14   :  { %913 = vmatpush3.msra.mxu0 %v752_v21  ;;  %883 = vmatprep.subr.mxu1 %v1007_v0  ;;  %v711_v1 = vld [vmem:[%s1327_s5 + $0x8] sm:$0xff]  ;;  %v370_v4 = vld [vmem:[%s1329_s4] sm:$0xff]  ;;  %v783_v10 = vld [vmem:[%s1329_s4 + $0x30] sm:$0xff] }
  0x15   :  { %914 = vmatprep.subr.mxu0 %v1007_v0  ;;  %884 = vmatpush3.msra.mxu1 %v118_v22  ;;  %v371_v7 = vld [vmem:[%s1329_s4 + $0x8] sm:$0xff]  ;;  %v779_v8 = vld [vmem:[%s1329_s4 + $0x20] sm:$0xff]  ;;  %v784_v12 = vld [vmem:[%s1329_s4 + $0x38] sm:$0xff] }
  0x16   :  { %915 = vmatpush3.msra.mxu0 %v751_v23  ;;  %885 = vmatprep.subr.mxu1 %v1007_v0  ;;  %v780_v9 = vld [vmem:[%s1329_s4 + $0x28] sm:$0xff] }
  0x17   :  { %916 = vmatprep.subr.mxu0 %v1007_v0  ;;  %886 = vmatpush3.msra.mxu1 %v117_v24 }
  0x18   :  { %917 = vmatpush3.msra.mxu0 %v750_v25  ;;  %887 = vmatprep.subr.mxu1 %v1007_v0 }
  0x19   :  { %918 = vmatprep.subr.mxu0 %v1007_v0  ;;  %888 = vmatpush3.msra.mxu1 %v116_v26 }
  0x1a   :  { %919 = vmatpush3.msra.mxu0 %v749_v27  ;;  %889 = vmatprep.subr.mxu1 %v1007_v0 }
  0x1b   :  { %920 = vmatprep.subr.mxu0 %v1007_v0  ;;  %890 = vmatpush3.msra.mxu1 %v115_v28 }
  0x1c   :  { %921 = vmatpush3.msra.mxu0 %v748_v29  ;;  %891 = vmatprep.subr.mxu1 %v1007_v0 }
  0x1d   :  { %922 = vmatprep.subr.mxu0 %v1007_v0  ;;  %892 = vmatpush3.msra.mxu1 %v114_v30 }
  0x1e   :  { %923 = vmatpush3.msra.mxu0 %v747_v31  ;;  %893 = vmatprep.subr.mxu1 %v1007_v0 }
  0x1f   :  { %924 = vmatprep.subr.mxu0 %v1007_v0  ;;  %894 = vmatpush3.msra.mxu1 %v113_v32 }
  0x20   :  { %925 = vmatpush3.msra.mxu0 %v746_v33  ;;  %895 = vmatprep.subr.mxu1 %v1007_v0 }
  0x21   :  { %926 = vmatprep.subr.mxu0 %v1007_v0  ;;  %896 = vmatpush3.msra.mxu1 %v112_v34 }
  0x22   :  { %927 = vmatpush3.msra.mxu0 %v745_v35  ;;  %897 = vmatprep.subr.mxu1 %v1007_v0 }
  0x23   :  { %928 = vmatprep.subr.mxu0 %v1007_v0  ;;  %901 = vmatprep.mubr.msk.f32.mxu1 %vm1008_vm0, %v1007_v0 }
  0x24   :  { %929 = vmatpush3.msra.mxu0 %v744_v36  ;;  %936 = vmatprep.mubr.msk.f32.mxu0 %vm1008_vm0, %v1007_v0 }
  0x25   :  { %930 = vmatprep.subr.mxu0 %v1007_v0  ;;  %998 = vset.pattern.permute.xlu1 %v1009_v3 }
  0x26   :  { %931 = vmatpush3.msra.mxu0 %v743_v37  ;;  %898 = vmatpush3.msra.mxu1 %v111_v38 }
  0x27   :  { %932 = vmatprep.subr.mxu0 %v1007_v0  ;;  %899 = vmatprep.subr.mxu1 %v1007_v0 }
  0x28   :  { %933 = vmatpush3.msra.mxu0 %v742_v39  ;;  %900 = vmatpush3.msra.mxu1 %v110_v40 }
  0x29   :  { %934 = vmatprep.subr.mxu0 %v1007_v0  ;;  %939 = vmatprep.subr.mxu1 %v1007_v0 }
  0x2a   :  { %935 = vmatpush3.msra.mxu0 %v741_v41  ;;  %719 = vperm.xlu1 %998, %v711_v1  }
  0x7f   :  { %v33_v42 = vpop.permute.xlu0 %32 }
  0x83   :  { %v715_v30 = vpop.permute.xlu0 %714 }
  0xa5   :  { %v720_v24 = vpop.permute.xlu1 %719 }
  0xcb   :  { %v105_v43 = vpop.f32.mrf.mxu0 }
  0xcc   :  { %v106_v44 = vadd.f32 %v105_v43, %v33_v42 }
  0xcd   :  { %v868_v45 = vpop.f32.mrf.mxu0 }
  0xce   :  { %v1211_v46 = vmax.f32 %v106_v44, 0.0 }
  0xd0   :  { %902 = vmatmul.mubr.f32.vlgmr.msra.gmra.mxu1 %v1211_v46  ;;  %937 = vmatmul.mubr.f32.vlgmr.msra.gmra.mxu0 %v1211_v46 }
  0xd1   :  { %940 = vmatpush3.msra.mxu1 %v772_v47  ;;  %971 = vmatprep.mubr.msk.f32.mxu1 %vm1008_vm0, %v1007_v0 }
  0xd2   :  { %941 = vmatprep.subr.mxu1 %v1007_v0  ;;  %976 = vmatprep.mubr.msk.f32.mxu0 %vm375_vm2, %v773_v63 }
  0xd3   :  { %942 = vmatpush3.msra.mxu1 %v771_v48 }
  0xd4   :  { %943 = vmatprep.subr.mxu1 %v1007_v0 }
  0xd5   :  { %944 = vmatpush3.msra.mxu1 %v770_v49 }
  0xd6   :  { %945 = vmatprep.subr.mxu1 %v1007_v0 }
  0xd7   :  { %946 = vmatpush3.msra.mxu1 %v769_v50 }
  0xd8   :  { %947 = vmatprep.subr.mxu1 %v1007_v0 }
  0xd9   :  { %948 = vmatpush3.msra.mxu1 %v768_v51 }
  0xda   :  { %949 = vmatprep.subr.mxu1 %v1007_v0 }
  0xdb   :  { %950 = vmatpush3.msra.mxu1 %v767_v52 }
  0xdc   :  { %951 = vmatprep.subr.mxu1 %v1007_v0 }
  0xdd   :  { %952 = vmatpush3.msra.mxu1 %v766_v53 }
  0xde   :  { %953 = vmatprep.subr.mxu1 %v1007_v0 }
  0xdf   :  { %954 = vmatpush3.msra.mxu1 %v765_v54 }
  0xe0   :  { %955 = vmatprep.subr.mxu1 %v1007_v0 }
  0xe1   :  { %956 = vmatpush3.msra.mxu1 %v764_v55 }
  0xe2   :  { %957 = vmatprep.subr.mxu1 %v1007_v0 }
  0xe3   :  { %958 = vmatpush3.msra.mxu1 %v763_v56 }
  0xe4   :  { %959 = vmatprep.subr.mxu1 %v1007_v0 }
  0xe5   :  { %960 = vmatpush3.msra.mxu1 %v762_v57 }
  0xe6   :  { %961 = vmatprep.subr.mxu1 %v1007_v0 }
  0xe7   :  { %962 = vmatpush3.msra.mxu1 %v761_v58 }
  0xe8   :  { %963 = vmatprep.subr.mxu1 %v1007_v0 }
  0xe9   :  { %964 = vmatpush3.msra.mxu1 %v760_v59 }
  0xea   :  { %965 = vmatprep.subr.mxu1 %v1007_v0 }
  0xeb   :  { %966 = vmatpush3.msra.mxu1 %v759_v60 }
  0xec   :  { %967 = vmatprep.subr.mxu1 %v1007_v0 }
  0xed   :  { %968 = vmatpush3.msra.mxu1 %v758_v61 }
  0xee   :  { %969 = vmatprep.subr.mxu1 %v1007_v0  ;;  %v774_v0 = vld [vmem:[%s1329_s4 + $0x18] sm:$0xff] }
  0xef   :  { %970 = vmatpush3.msra.mxu1 %v757_v62 }
  0xf0   :  { %972 = vmatmul.mubr.f32.vlgmr.msra.gmra.mxu1 %v1211_v46 }
 0x190   :  { %v192_v2 = vpop.f32.mrf.mxu1  ;;  %v279_v3 = vpop.f32.mrf.mxu0 }
 0x191   :  { %974 = vmatprep.subr.mxu0 %v192_v2 }
 0x192   :  { %v903_v5 = vpop.f32.mrf.mxu1  ;;  %v938_v6 = vpop.f32.mrf.mxu0  ;;  %975 = vmatpush3.msra.mxu0 %v192_v2 }
 0x193   :  { %977 = vmatmul.mubr.msk.f32.vlgmr.msra.gmra.mxu0 %vm375_vm2, %v774_v0  ;;  %979 = vmatprep.subr.mxu0 %v1211_v46 }
 0x194   :  { %980 = vmatpush3.msra.mxu0 %v1211_v46  ;;  %981 = vmatprep.mubr.msk.f32.mxu0 %vm375_vm2, %v370_v4 }
 0x195   :  { %984 = vmatprep.subr.mxu0 %v279_v3 }
 0x197   :  { %982 = vmatmul.mubr.msk.f32.vlgmr.msra.gmra.mxu0 %vm375_vm2, %v371_v7 }
 0x198   :  { %985 = vmatpush3.msra.mxu0 %v279_v3  ;;  %986 = vmatprep.mubr.msk.f32.mxu0 %vm375_vm2, %v779_v8 }
 0x19b   :  { %987 = vmatmul.mubr.msk.f32.vlgmr.msra.gmra.mxu0 %vm375_vm2, %v780_v9 }
 0x19c   :  { %991 = vmatprep.mubr.msk.f32.mxu0 %vm375_vm2, %v783_v10 }
 0x1b0   :  { %v366_v11 = vpop.f32.mrf.mxu1 }
 0x1b1   :  { %989 = vmatprep.subr.mxu0 %v366_v11 }
 0x1b2   :  { %v973_v13 = vpop.f32.mrf.mxu1  ;;  %990 = vmatpush3.msra.mxu0 %v366_v11 }
 0x1b3   :  { %992 = vmatmul.mubr.msk.f32.vlgmr.msra.gmra.mxu0 %vm375_vm2, %v784_v12 }
 0x253   :  { %v978_v14 = vpop.f32.mrf.mxu0 }
 0x255   :  { %v448_v15 = vpop.f32.mrf.mxu0 }
 0x257   :  { %v983_v16 = vpop.f32.mrf.mxu0 }
 0x258   :  { %v535_v19 = vadd.f32 %v983_v16, %v978_v14 }
 0x259   :  { %v529_v17 = vpop.f32.mrf.mxu0 }
 0x25a   :  { %v530_v20 = vadd.f32 %v529_v17, %v448_v15 }
 0x25b   :  { %v988_v18 = vpop.f32.mrf.mxu0 }
 0x25c   :  { %v623_v22 = vadd.f32 %v988_v18, %v535_v19 }
 0x25d   :  { %v613_v21 = vpop.f32.mrf.mxu0 }
 0x25e   :  { %v622_v25 = vadd.f32 %v613_v21, %v530_v20 }
 0x273   :  { %v993_v23 = vpop.f32.mrf.mxu0 }
 0x274   :  { %v709_v26 = vadd.f32 %v993_v23, %v623_v22 }
 0x275   :  { %v699_v27 = vpop.f32.mrf.mxu0 }
 0x276   :  { %v723_v28 = vadd.f32 %v720_v24, %v709_v26  ;;  %v708_v29 = vadd.f32 %v699_v27, %v622_v25 }
 0x278   :  { %v725_v31 = vsub.f32 0.0, %v723_v28  ;;  %v722_v32 = vadd.f32 %v715_v30, %v708_v29 }
 0x27a   :  { %v728_v33 = vmul.f32 1.442695, %v725_v31  ;;  %v724_v34 = vsub.f32 0.0, %v722_v32 }
 0x27c   :  { %999 = vpow2.f32 %v728_v33  ;;  %v726_v35 = vmul.f32 1.442695, %v724_v34 }
 0x27e   :  { %1001 = vpow2.f32 %v726_v35 }
 0x289   :  { %v1000_v36 = vpop.eup %999 }
 0x28a   :  { %v731_v37 = vadd.f32 1.0, %v1000_v36 }
 0x28b   :  { %v1002_v38 = vpop.eup %1001 }
 0x28c   :  { %1003 = vrcp.f32 %v731_v37  ;;  %v730_v39 = vadd.f32 1.0, %v1002_v38 }
 0x28e   :  { %1005 = vrcp.f32 %v730_v39 }
 0x299   :  { %v1004_v40 = vpop.eup %1003 }
 0x29a   :  { %735 = vst [vmem:[%s1330_s6 + $0x8] sm:$0xff] %v1004_v40 }
 0x29b   :  { %v1006_v41 = vpop.eup %1005 }
 0x29c   :  { %734 = vst [vmem:[%s1330_s6] sm:$0xff] %v1006_v41 }

</bundles_post_ra>
